<compile_context>
chip_gen: v7x
topology: tpu7x:2x2x1
jax: 0.10.0
libtpu: 0.0.40
codegen_flags: <defaults>
</compile_context>

<pallas_src>
import math
from functools import partial

import jax
import jax.numpy as jnp
from jax.experimental import pallas as pl
from jax.experimental.pallas import tpu as pltpu

# ---- deterministic "simulator" parameters / hyper-parameters ----
D_THETA = 8
D_X = 32
SIGMA_P = 1.0   # prior std
SIGMA_X = 0.5   # likelihood std
LOG_2PI = math.log(2.0 * math.pi)

G = 4                 # samples packed per sublane row (G * D_X == 128 lanes, fully dense)
TBR_MAX = 4096        # max packed rows per grid step (== G * TBR_MAX = 16384 samples)

# constant part of  log N(x; m, sx^2 I) - log N(theta; 0, sp^2 I), folded once
_CONST = (-D_X * (0.5 * LOG_2PI + math.log(SIGMA_X))
          + D_THETA * (0.5 * LOG_2PI + math.log(SIGMA_P)))


def _lte_ratio_kernel(th_ref, x_ref, wbig_ref, bbig_ref, ax_ref, at_ref, out_ref):
    """Per packed row r (holding samples 4r..4r+3) computes, per sample g:
         -0.5/sx^2 * sum_j (x - theta@W - b)_j^2 + 0.5/sp^2 * sum_k theta_k^2 + _CONST
    """
    th = th_ref[...]          # (tbr, G*D_THETA)  -- 4 samples per row
    xx = x_ref[...]           # (tbr, G*D_X)      -- 4 samples per row, lane-dense

    # likelihood mean for all G packed samples at once via block-diagonal W (MXU)
    mean = jnp.dot(th, wbig_ref[...], preferred_element_type=jnp.float32) + bbig_ref[...]
    d = xx - mean             # (tbr, G*D_X)

    # per-sample segment sums via MXU; the -0.5/sx^2 and +0.5/sp^2 scales are folded
    # into the constant segment matrices, so no extra VPU scaling passes are needed.
    lx = jnp.dot(d * d, ax_ref[...], preferred_element_type=jnp.float32)    # (tbr, G)
    lt = jnp.dot(th * th, at_ref[...], preferred_element_type=jnp.float32)  # (tbr, G)

    out_ref[...] = lx + lt + _CONST                                          # (tbr, G)


def _round_up(n, m):
    return ((n + m - 1) // m) * m


@partial(jax.jit, static_argnames=("block_rows",))
def lte_ratio(theta, x, w, b, *, block_rows=None):
    """log p(x | theta) - log p(theta), shape (B,)."""
    B = theta.shape[0]
    theta = theta.astype(jnp.float32)
    x = x.astype(jnp.float32)
    w = w.astype(jnp.float32)
    b = b.astype(jnp.float32)

    # Pad the batch so it packs evenly into G samples per row and whole 8-row sublane
    # groups. Padded rows produce finite garbage that is sliced off at the end.
    Bp = _round_up(B, G * 8)
    if Bp != B:
        theta = jnp.pad(theta, ((0, Bp - B), (0, 0)))
        x = jnp.pad(x, ((0, Bp - B), (0, 0)))
    R = Bp // G                                    # packed rows

    # Zero-copy, row-major packing: G consecutive samples per sublane row.
    theta_p = theta.reshape(R, G * D_THETA)        # (R, 32)
    x_p = x.reshape(R, G * D_X)                    # (R, 128)

    # Small constant operands (computed once per call; invariant blocks in the kernel):
    eye_g = jnp.eye(G, dtype=jnp.float32)
    w_big = jnp.kron(eye_g, w)                                      # (G*D_THETA, G*D_X)
    b_big = jnp.tile(b.reshape(1, D_X), (1, G))                     # (1, G*D_X)
    a_x = jnp.kron(eye_g, jnp.full((D_X, 1), -0.5 / (SIGMA_X * SIGMA_X), jnp.float32))
    a_t = jnp.kron(eye_g, jnp.full((D_THETA, 1), 0.5 / (SIGMA_P * SIGMA_P), jnp.float32))

    if block_rows is None:
        # Biggest tile that fits comfortably in VMEM, but keep >= 2 grid steps when
        # possible so both TensorCores are used on v7x.
        tbr = min(TBR_MAX, max(8, _round_up(pl.cdiv(R, 2), 8)))
    else:
        tbr = block_rows
    grid = (pl.cdiv(R, tbr),)

    out = pl.pallas_call(
        _lte_ratio_kernel,
        out_shape=jax.ShapeDtypeStruct((R, G), jnp.float32),
        grid_spec=pltpu.PrefetchScalarGridSpec(
            num_scalar_prefetch=0,
            grid=grid,
            in_specs=[
                pl.BlockSpec((tbr, G * D_THETA), lambda i: (i, 0)),   # packed theta
                pl.BlockSpec((tbr, G * D_X), lambda i: (i, 0)),       # packed x
                pl.BlockSpec((G * D_THETA, G * D_X), lambda i: (0, 0)),  # block-diag W
                pl.BlockSpec((1, G * D_X), lambda i: (0, 0)),            # tiled b
                pl.BlockSpec((G * D_X, G), lambda i: (0, 0)),            # x segment-sum
                pl.BlockSpec((G * D_THETA, G), lambda i: (0, 0)),        # theta segment-sum
            ],
            out_specs=pl.BlockSpec((tbr, G), lambda i: (i, 0)),
        ),
        compiler_params=pltpu.CompilerParams(
            dimension_semantics=("parallel",),
            vmem_limit_bytes=32 * 1024 * 1024,
        ),
    )(theta_p, x_p, w_big, b_big, a_x, a_t)

    return out.reshape(Bp)[:B]


def lte_ratio_ref(theta, x, w, b):
    """Pure-JAX reference for correctness checking."""
    theta = theta.astype(jnp.float32)
    x = x.astype(jnp.float32)
    mean = theta @ w + b
    lkh = (-0.5 * jnp.sum(((x - mean) / SIGMA_X) ** 2, axis=-1)
           - D_X * (0.5 * LOG_2PI + math.log(SIGMA_X)))
    pri = (-0.5 * jnp.sum((theta / SIGMA_P) ** 2, axis=-1)
           - D_THETA * (0.5 * LOG_2PI + math.log(SIGMA_P)))
    return lkh - pri


if __name__ == "__main__":
    key = jax.random.PRNGKey(0)
    k_th, k_x, k_w, k_b = jax.random.split(key, 4)

    B = 64
    theta = jax.random.normal(k_th, (B, D_THETA), dtype=jnp.float32)
    x = jax.random.normal(k_x, (B, D_X), dtype=jnp.float32)

    # deterministic simulator parameters (likelihood mean map)
    w = 0.1 * jax.random.normal(k_w, (D_THETA, D_X), dtype=jnp.float32)
    b = 0.05 * jax.random.normal(k_b, (D_X,), dtype=jnp.float32)

    out = lte_ratio(theta, x, w, b)
    jax.block_until_ready(out)

    ref = lte_ratio_ref(theta, x, w, b)
    assert out.shape == (B,)
    assert jnp.allclose(out, ref, atol=1e-3, rtol=1e-4), (out, ref)

    # also exercise the ragged-batch padding path
    out2 = lte_ratio(theta[:50], x[:50], w, b)
    jax.block_until_ready(out2)
    assert out2.shape == (50,)
    assert jnp.allclose(out2, ref[:50], atol=1e-3, rtol=1e-4)

    print("KERNEL_OK")
</pallas_src>

<mosaic_0001>
module attributes {stable_mosaic.version = 11 : i64} {
  func.func @_lte_ratio_kernel(%arg0: i32, %arg1: memref<8x32xf32, #tpu.memory_space<vmem>>, %arg2: memref<8x128xf32, #tpu.memory_space<vmem>>, %arg3: memref<32x128xf32, #tpu.memory_space<vmem>>, %arg4: memref<1x128xf32, #tpu.memory_space<vmem>>, %arg5: memref<128x4xf32, #tpu.memory_space<vmem>>, %arg6: memref<32x4xf32, #tpu.memory_space<vmem>>, %arg7: memref<8x4xf32, #tpu.memory_space<vmem>>) attributes {dimension_semantics = [#tpu.dimension_semantics<parallel>], iteration_bounds = array<i64: 2>, scalar_prefetch = 0 : i64, scratch_operands = 0 : i64, tpu.core_type = #tpu.core_type<tc>, window_params = [{transform_indices = @transform_0, window_bounds = array<i64: 8, 32>}, {transform_indices = @transform_1, window_bounds = array<i64: 8, 128>}, {pipeline_mode = #tpu.pipeline_mode<synchronous>, transform_indices = @transform_2, window_bounds = array<i64: 32, 128>}, {pipeline_mode = #tpu.pipeline_mode<synchronous>, transform_indices = @transform_3, window_bounds = array<i64: 1, 128>}, {pipeline_mode = #tpu.pipeline_mode<synchronous>, transform_indices = @transform_4, window_bounds = array<i64: 128, 4>}, {pipeline_mode = #tpu.pipeline_mode<synchronous>, transform_indices = @transform_5, window_bounds = array<i64: 32, 4>}, {transform_indices = @transform_6, window_bounds = array<i64: 8, 4>}]} {
    %c0 = arith.constant 0 : index
    %c0_0 = arith.constant 0 : index
    %0 = vector.load %arg1[%c0, %c0_0] : memref<8x32xf32, #tpu.memory_space<vmem>>, vector<8x32xf32>
    %c0_1 = arith.constant 0 : index
    %c0_2 = arith.constant 0 : index
    %1 = vector.load %arg2[%c0_1, %c0_2] : memref<8x128xf32, #tpu.memory_space<vmem>>, vector<8x128xf32>
    %c0_3 = arith.constant 0 : index
    %c0_4 = arith.constant 0 : index
    %2 = vector.load %arg3[%c0_3, %c0_4] : memref<32x128xf32, #tpu.memory_space<vmem>>, vector<32x128xf32>
    %cst = arith.constant dense<0.000000e+00> : vector<8x128xf32>
    %3 = tpu.matmul %0, %2, %cst {dimension_numbers = #tpu.dot_dimension_numbers<[1], [0], [0], [1], [0, 0, 1, 1], [], []>} : vector<8x32xf32>, vector<32x128xf32>, vector<8x128xf32> -> vector<8x128xf32>
    %c0_5 = arith.constant 0 : index
    %c0_6 = arith.constant 0 : index
    %4 = vector.load %arg4[%c0_5, %c0_6] : memref<1x128xf32, #tpu.memory_space<vmem>>, vector<1x128xf32>
    %5 = vector.broadcast %4 : vector<1x128xf32> to vector<8x128xf32>
    %6 = arith.addf %3, %5 : vector<8x128xf32>
    %7 = arith.subf %1, %6 : vector<8x128xf32>
    %8 = arith.mulf %7, %7 : vector<8x128xf32>
    %c0_7 = arith.constant 0 : index
    %c0_8 = arith.constant 0 : index
    %9 = vector.load %arg5[%c0_7, %c0_8] : memref<128x4xf32, #tpu.memory_space<vmem>>, vector<128x4xf32>
    %cst_9 = arith.constant dense<0.000000e+00> : vector<8x4xf32>
    %10 = tpu.matmul %8, %9, %cst_9 {dimension_numbers = #tpu.dot_dimension_numbers<[1], [0], [0], [1], [0, 0, 1, 1], [], []>} : vector<8x128xf32>, vector<128x4xf32>, vector<8x4xf32> -> vector<8x4xf32>
    %11 = arith.mulf %0, %0 : vector<8x32xf32>
    %c0_10 = arith.constant 0 : index
    %c0_11 = arith.constant 0 : index
    %12 = vector.load %arg6[%c0_10, %c0_11] : memref<32x4xf32, #tpu.memory_space<vmem>>, vector<32x4xf32>
    %cst_12 = arith.constant dense<0.000000e+00> : vector<8x4xf32>
    %13 = tpu.matmul %11, %12, %cst_12 {dimension_numbers = #tpu.dot_dimension_numbers<[1], [0], [0], [1], [0, 0, 1, 1], [], []>} : vector<8x32xf32>, vector<32x4xf32>, vector<8x4xf32> -> vector<8x4xf32>
    %14 = arith.addf %10, %13 : vector<8x4xf32>
    %cst_13 = arith.constant 0.126184985 : f32
    %15 = vector.broadcast %cst_13 : f32 to vector<8x4xf32>
    %16 = arith.addf %14, %15 : vector<8x4xf32>
    %c0_14 = arith.constant 0 : index
    %c0_15 = arith.constant 0 : index
    %17 = vector.load %arg7[%c0_14, %c0_15] : memref<8x4xf32, #tpu.memory_space<vmem>>, vector<8x4xf32>
    tpu.vector_store %arg7[%c0_14, %c0_15], %16 {strides = array<i32>} : memref<8x4xf32, #tpu.memory_space<vmem>>, vector<8x4xf32>,
    return
  }
  func.func @transform_0(%arg0: i32) -> (i32, i32) {
    %c0_i32 = arith.constant 0 : i32
    %c0_i32_0 = arith.constant 0 : i32
    return %arg0, %c0_i32 : i32, i32
  }
  func.func @transform_1(%arg0: i32) -> (i32, i32) {
    %c0_i32 = arith.constant 0 : i32
    %c0_i32_0 = arith.constant 0 : i32
    return %arg0, %c0_i32 : i32, i32
  }
  func.func @transform_2(%arg0: i32) -> (i32, i32) {
    %c0_i32 = arith.constant 0 : i32
    %c0_i32_0 = arith.constant 0 : i32
    %c0_i32_1 = arith.constant 0 : i32
    return %c0_i32, %c0_i32_0 : i32, i32
  }
  func.func @transform_3(%arg0: i32) -> (i32, i32) {
    %c0_i32 = arith.constant 0 : i32
    %c0_i32_0 = arith.constant 0 : i32
    %c0_i32_1 = arith.constant 0 : i32
    return %c0_i32, %c0_i32_0 : i32, i32
  }
  func.func @transform_4(%arg0: i32) -> (i32, i32) {
    %c0_i32 = arith.constant 0 : i32
    %c0_i32_0 = arith.constant 0 : i32
    %c0_i32_1 = arith.constant 0 : i32
    return %c0_i32, %c0_i32_0 : i32, i32
  }
  func.func @transform_5(%arg0: i32) -> (i32, i32) {
    %c0_i32 = arith.constant 0 : i32
    %c0_i32_0 = arith.constant 0 : i32
    %c0_i32_1 = arith.constant 0 : i32
    return %c0_i32, %c0_i32_0 : i32, i32
  }
  func.func @transform_6(%arg0: i32) -> (i32, i32) {
    %c0_i32 = arith.constant 0 : i32
    %c0_i32_0 = arith.constant 0 : i32
    return %arg0, %c0_i32 : i32, i32
  }
}

</mosaic_0001>

<bundles_post_ra>
// kernel: lte_ratio.1
= control target key start
LH: loop header
LB: loop body
LE: loop exit
PB: predicated region body
PF: predicated region fallthrough
CT: control target
= control target key end

     0   :  { %s775_s21 = smov 0   ;;  %s892_s0 = inlined_call_operand.vmem [shape: f32[16,32], index: 0, kind: input, shape index: {}]   ;;  %s893_s1 = inlined_call_operand.vmem [shape: f32[16,128], index: 1, kind: input, shape index: {}]   ;;  %s894_s2 = inlined_call_operand.vmem [shape: f32[32,128], index: 2, kind: input, shape index: {}]   ;;  %s895_s3 = inlined_call_operand.vmem [shape: f32[1,128], index: 3, kind: input, shape index: {}]   ;;  %s896_s4 = inlined_call_operand.vmem [shape: f32[128,4], index: 4, kind: input, shape index: {}]   ;;  %s897_s5 = inlined_call_operand.vmem [shape: f32[32,4], index: 5, kind: input, shape index: {}]   ;;  %s898_s6 = inlined_call_operand.vmem [shape: f32[16,4], index: 6, kind: output, shape index: {}]  }
   0x1 LB: > { %s585_s22 = sadd.s32 4294967295, %s735_s21   ;;  %p589_p0 = scmp.ge.s32.totalorder %s735_s21, 1  ;;  %s735_s21 = sphi %s775_s21, %s16_s21  }
   0x2   : > { %p220_p1 = scmp.lt.s32.totalorder %s735_s21, 3 }
   0x4   : > { %p221_p2 = pnand %p589_p0, %p220_p1 }
   0x5   : > { %v266_v0 = vld [vmem:[%s894_s2] sm:$0xff] (!%p221_p2)  ;;  %v267_v1 = vld [vmem:[%s894_s2 + $0x8] sm:$0xff] (!%p221_p2)  ;;  %v268_v2 = vld [vmem:[%s894_s2 + $0x10] sm:$0xff] (!%p221_p2)  ;;  %v737_v3 = vmov (!%p221_p2), 0.0|0.0   ;;  %vm738_vm0 = vmmov (!%p221_p2), 0   ;;  %v739_v6 = vmov (!%p221_p2), 0.0  }
   0x6   : > { %224 = sbr.rel (%p221_p2) target bundleno = 452 (0x1c4), region = 44  ;;  %682 = vmatprep.subr.bf16.mxu1 (!%p221_p2), %v737_v3  ;;  %v683_v4 = vpack.c.bf16 (!%p221_p2), %v267_v1, %v266_v0  ;;  %v269_v5 = vld [vmem:[%s894_s2 + $0x18] sm:$0xff] (!%p221_p2)  ;;  %633 = vmatprep.mubr.msk.f32.mxu1 (!%p221_p2), %vm738_vm0, %v739_v6  ;;  %p252_p3 = scmp.lt.s32.totalorder (!%p221_p2), %s585_s22, 1  ;;  %v353_v7 = vld [vmem:[%s896_s4] sm:$0xff] (!%p221_p2)  ;;  %v354_v8 = vld [vmem:[%s896_s4 + $0x8] sm:$0xff] (!%p221_p2)  ;;  %vm277_vm1 = vcmask (!%p221_p2), 261120  }
   0x7   : > { %694 = vmatprep.subr.bf16.mxu0 (!%p221_p2), %v737_v3  ;;  %v695_v9 = vpack.c.bf16 (!%p221_p2), %v354_v8, %v353_v7  ;;  %v355_v10 = vld [vmem:[%s896_s4 + $0x10] sm:$0xff] (!%p221_p2)  ;;  %v356_v11 = vld [vmem:[%s896_s4 + $0x18] sm:$0xff] (!%p221_p2)  ;;  %679 = vmatprep.mubr.msk.f32.mxu0 (!%p221_p2), %vm738_vm0, %v739_v6  ;;  %v686_v12 = vpack.c.bf16 (!%p221_p2), %v269_v5, %v268_v2  ;;  %v357_v14 = vld [vmem:[%s896_s4 + $0x20] sm:$0xff] (!%p221_p2)  ;;  %vm518_vm2 = vcmask (!%p221_p2), 31744  }
   0x8   : > { %684 = vmatpush3.bf16.msra.mxu1 (!%p221_p2), %v683_v4  ;;  %v698_v13 = vpack.c.bf16 (!%p221_p2), %v356_v11, %v355_v10  ;;  %v358_v15 = vld [vmem:[%s896_s4 + $0x28] sm:$0xff] (!%p221_p2)  ;;  %v370_v16 = vld [vmem:[%s897_s5] sm:$0xff] (!%p221_p2)  ;;  %v359_v21 = vld [vmem:[%s896_s4 + $0x30] sm:$0xff] (!%p221_p2) }
   0x9   : > { %685 = vmatprep.subr.bf16.mxu1 (!%p221_p2), %v737_v3  ;;  %696 = vmatpush3.bf16.msra.mxu0 (!%p221_p2), %v695_v9  ;;  %v371_v17 = vld [vmem:[%s897_s5 + $0x8] sm:$0xff] (!%p221_p2)  ;;  %v701_v20 = vpack.c.bf16 (!%p221_p2), %v358_v15, %v357_v14  ;;  %v360_v22 = vld [vmem:[%s896_s4 + $0x38] sm:$0xff] (!%p221_p2)  ;;  %v361_v24 = vld [vmem:[%s896_s4 + $0x40] sm:$0xff] (!%p221_p2) }
   0xa   : > { %697 = vmatprep.subr.bf16.mxu0 (!%p221_p2), %v737_v3  ;;  %v689_v19 = vpack.c.bf16 (!%p221_p2), %v371_v17, %v370_v16  ;;  %v704_v23 = vpack.c.bf16 (!%p221_p2), %v360_v22, %v359_v21  ;;  %v362_v25 = vld [vmem:[%s896_s4 + $0x48] sm:$0xff] (!%p221_p2)  ;;  %v363_v27 = vld [vmem:[%s896_s4 + $0x50] sm:$0xff] (!%p221_p2)  ;;  %v364_v28 = vld [vmem:[%s896_s4 + $0x58] sm:$0xff] (!%p221_p2) }
   0xb   : > { %v707_v26 = vpack.c.bf16 (!%p221_p2), %v362_v25, %v361_v24  ;;  %v710_v29 = vpack.c.bf16 (!%p221_p2), %v364_v28, %v363_v27  ;;  %v365_v30 = vld [vmem:[%s896_s4 + $0x60] sm:$0xff] (!%p221_p2)  ;;  %v366_v31 = vld [vmem:[%s896_s4 + $0x68] sm:$0xff] (!%p221_p2)  ;;  %v372_v33 = vld [vmem:[%s897_s5 + $0x10] sm:$0xff] (!%p221_p2) }
   0xc   : > { %687 = vmatpush3.bf16.msra.mxu1 (!%p221_p2), %v686_v12  ;;  %v713_v32 = vpack.c.bf16 (!%p221_p2), %v366_v31, %v365_v30  ;;  %v373_v34 = vld [vmem:[%s897_s5 + $0x18] sm:$0xff] (!%p221_p2)  ;;  %v367_v36 = vld [vmem:[%s896_s4 + $0x70] sm:$0xff] (!%p221_p2)  ;;  %v593_v40 = vld [vmem:[%s895_s3] ss:$0 sm:$0xff] (!%p221_p2) }
   0xd   : > { %s900_s22 = smov (!%p252_p3, %s585_s22), 1  ;;  %699 = vmatpush3.bf16.msra.mxu0 %v698_v13  ;;  %688 = vmatprep.subr.bf16.mxu1 %v737_v3  ;;  %v692_v35 = vpack.c.bf16 %v373_v34, %v372_v33  ;;  %v368_v37 = vld [vmem:[%s896_s4 + $0x78] sm:$0xff] }
   0xe   : > { %s815_s17 = sshll.u32 %s900_s22, 3  ;;  %700 = vmatprep.subr.bf16.mxu0 %v737_v3  ;;  %v716_v39 = vpack.c.bf16 %v368_v37, %v367_v36 }
   0xf   : > { %s255_s22 = scalar_lea.vmem %s892_s0, %s815_s17  ;;  %s259_s8 = scalar_lea.vmem %s893_s1, %s815_s17 }
  0x10   : > { %v264_v18 = vld [vmem:[%s255_s22] sm:$0xff]  ;;  %s263_s13 = scalar_lea.vmem %s898_s6, %s815_s17 }
  0x11   : > { %634 = vmatmul.mubr.msk.f32.vlgmr.msra.gmra.mrb[0].mxu1 %vm277_vm1, %v264_v18  ;;  %702 = vmatpush3.bf16.msra.mxu0 %v701_v20  ;;  %v369_v38 = vmul.f32 %v264_v18, %v264_v18  ;;  %v265_v41 = vld [vmem:[%s259_s8] sm:$0xff] }
  0x12   : > { %690 = vmatpush3.bf16.msra.mxu1 %v689_v19  ;;  %644 = vmatprep.mubr.msk.f32.mxu1 %vm738_vm0, %v739_v6 }
  0x13   : > { %691 = vmatprep.subr.bf16.mxu1 %v737_v3  ;;  %703 = vmatprep.subr.bf16.mxu0 %v737_v3 }
  0x15   : > { %705 = vmatpush3.bf16.msra.mxu0 %v704_v23 }
  0x16   : > { %706 = vmatprep.subr.bf16.mxu0 %v737_v3  ;;  %693 = vmatpush3.bf16.msra.mxu1 %v692_v35 }
  0x19   : > { %708 = vmatpush3.bf16.msra.mxu0 %v707_v26  ;;  %645 = vmatmul.mubr.msk.f32.vlgmr.msra.gmra.mrb[2].mxu1 %vm277_vm1, %v369_v38 }
  0x1a   : > { %709 = vmatprep.subr.bf16.mxu0 %v737_v3 }
  0x1d   : > { %711 = vmatpush3.bf16.msra.mxu0 %v710_v29 }
  0x1e   : > { %712 = vmatprep.subr.bf16.mxu0 %v737_v3 }
  0x21   : > { %714 = vmatpush3.bf16.msra.mxu0 %v713_v32 }
  0x22   : > { %715 = vmatprep.subr.bf16.mxu0 %v737_v3 }
  0x25   : > { %717 = vmatpush3.bf16.msra.mxu0 %v716_v39 }
  0xe4   : > { %v347_v42 = vpop.f32.mrb[0].mxu1 }
  0xe5   : > { %v348_v43 = vadd.f32 %v593_v40, %v347_v42  ;;  %v635_v44 = vpop.f32.mrb[1].mxu1 }
  0xe7   : > { %v351_v45 = vsub.f32 %v265_v41, %v348_v43 }
  0xe9   : > { %v352_v46 = vmul.f32 %v351_v45, %v351_v45 }
  0xeb   : > { %680 = vmatmul.mubr.f32.vlgmr.msra.gmra.mrb[0].mxu0 %v352_v46 }
  0xec   : > { %v443_v47 = vpop.f32.mrb[2].mxu1 }
  0xed   : > { %v646_v48 = vpop.f32.mrb[3].mxu1 }
 0x1be   : > { %v513_v49 = vpop.f32.mrb[0].mxu0 }
 0x1bf   : > { %v514_v50 = vadd.f32 %v513_v49, %v443_v47  ;;  %v681_v51 = vpop.f32.mrb[1].mxu0 }
 0x1c1   : > { %v517_v52 = vadd.f32 0.12618499, %v514_v50 }
 0x1c3   : > { %519 = vst.msk [vmem:[%s263_s13] sm:$0xff] %vm518_vm2, %v517_v52 }
 0x1c4 PF: > { %s16_s21 = sadd.s32 1, %s735_s21  }
 0x1c5   : > { %p13_p4 = scmp.ge.s32.totalorder %s16_s21, 4  }
 0x1c7   :  { %15 = sbr.rel (!%p13_p4) target bundleno = 1 (0x1), region = 77 }

</bundles_post_ra>
